<compile_context>
chip_gen: v6e
topology: v6e:2x2x1
jax: 0.10.0
libtpu: 0.0.40
codegen_flags: <defaults>
</compile_context>

<pallas_src>
import functools
import math
import re
from typing import NamedTuple

import jax
import jax.numpy as jnp
from jax.experimental import pallas as pl
from jax.experimental.pallas import tpu as pltpu


def _round_up(x, m):
    return ((x + m - 1) // m) * m


def _cdiv(a, b):
    return -(-a // b)


def _tpu_generation():
    """Best-effort TPU generation (5, 6, 7, ...); 0 if unknown."""
    try:
        kind = jax.devices()[0].device_kind.lower()
        m = re.search(r"v(\d+)", kind)
        return int(m.group(1)) if m else 0
    except Exception:
        return 0


class PreparedMLP(NamedTuple):
    """Weights/biases padded + cast ONCE, outside the per-call path."""
    w1: jax.Array
    b1: jax.Array
    w2: jax.Array
    b2: jax.Array
    w3: jax.Array
    b3: jax.Array
    dim_in: int
    hid_p: int
    dim_out: int


def prepare_mlp_params(params, compute_dtype=jnp.bfloat16):
    """Pad hidden dims to lane-dense multiples of 128 and cast to the compute dtype.
    Done once per parameter set, NOT per forward call."""
    w1, b1, w2, b2, w3, b3 = params
    dim_in, hidden = w1.shape
    dim_out = w3.shape[1]
    hid_p = _round_up(hidden, 128)

    def pad2(a, rows, cols):
        a = a.astype(jnp.float32)
        return jnp.pad(a, ((0, rows - a.shape[0]), (0, cols - a.shape[1])))

    return PreparedMLP(
        w1=pad2(w1, dim_in, hid_p).astype(compute_dtype),      # K = true dim_in
        b1=pad2(b1.reshape(1, -1), 1, hid_p),                  # biases stay f32
        w2=pad2(w2, hid_p, hid_p).astype(compute_dtype),
        b2=pad2(b2.reshape(1, -1), 1, hid_p),
        w3=pad2(w3, hid_p, dim_out).astype(compute_dtype),     # N = true dim_out
        b3=b3.reshape(1, -1).astype(jnp.float32),
        dim_in=dim_in, hid_p=hid_p, dim_out=dim_out,
    )


def _silu(x_f32, act_dtype, approx_recip):
    """SiLU = x * sigmoid(x).  exp runs on the EUP in act_dtype (bf16 on v6e/v7x
    halves EUP/VPU work); the reciprocal is evaluated in f32: approx EUP vrcp on
    the fast path, an exact divide on the f32 ("torch semantics") path."""
    xa = x_f32.astype(act_dtype)
    denom = (jnp.exp(-xa) + 1.0).astype(jnp.float32)
    if approx_recip:
        sig = pl.reciprocal(denom, approx=True)
    else:
        sig = 1.0 / denom
    return xa * sig.astype(act_dtype)


def mlp_kernel(x_ref, w1_ref, b1_ref, w2_ref, b2_ref, w3_ref, b3_ref, o_ref, *,
               act_dtype, approx_recip):
    """One (tm, dim_in) token tile through the fused 3-layer MLP."""
    cdt = w1_ref.dtype
    x = x_ref[...].astype(cdt)                      # cast in-kernel: no wrapper HBM pass

    a1 = jnp.dot(x, w1_ref[...], preferred_element_type=jnp.float32) + b1_ref[...]
    h1 = _silu(a1, act_dtype, approx_recip).astype(cdt)

    a2 = jnp.dot(h1, w2_ref[...], preferred_element_type=jnp.float32) + b2_ref[...]
    h2 = _silu(a2, act_dtype, approx_recip).astype(cdt)

    out = jnp.dot(h2, w3_ref[...], preferred_element_type=jnp.float32) + b3_ref[...]
    o_ref[...] = out.astype(o_ref.dtype)


def mlp_forward(x, prep: PreparedMLP, *, block_tokens=1024,
                out_dtype=jnp.float32, act_dtype=None):
    """x: (..., dim_in) -> (..., dim_out).  Matches torch MLP.forward(x.float())."""
    dim_in, hid_p, dim_out = prep.dim_in, prep.hid_p, prep.dim_out
    cdt = prep.w1.dtype
    assert x.shape[-1] == dim_in

    lead = x.shape[:-1]
    n = math.prod(lead)
    x2d = x.reshape(n, dim_in)
    if not jnp.issubdtype(x2d.dtype, jnp.floating):
        x2d = x2d.astype(jnp.float32)               # torch x.float(); floats cast in-kernel

    gen = _tpu_generation()
    if act_dtype is None:
        # bf16 activations only where VPU/EUP are bf16-native (v6e+); v5e stays f32.
        act_dtype = cdt if (cdt == jnp.bfloat16 and gen >= 6) else jnp.float32
    approx_recip = bool(cdt == jnp.bfloat16)        # exact reciprocal on the f32 path

    # --- token tiling --------------------------------------------------------
    sub = 16 if cdt == jnp.bfloat16 else 8          # sublane tile of compute dtype
    tm = min(block_tokens, _round_up(n, sub))
    steps = _cdiv(n, tm)
    if steps == 1 and tm > sub:
        tm = _round_up(_cdiv(n, 2), sub)            # >=2 steps -> both v7x TCs get work
    elif steps > 2 and steps % 2 == 1:
        tm_even = _round_up(_cdiv(n, steps + 1), sub)
        if _cdiv(n, tm_even) % 2 == 0:
            tm = tm_even                            # even step count -> balanced megacore split
    steps = _cdiv(n, tm)
    n_pad = steps * tm
    if n_pad != n:
        x2d = jnp.pad(x2d, ((0, n_pad - n), (0, 0)))   # rows only; features stay unpadded

    # --- VMEM budget / cost hint ---------------------------------------------
    if gen >= 7:
        vmem_limit = 48 * 1024 * 1024               # v7x: 64 MiB physical per TC
    elif gen in (5, 6):
        vmem_limit = 64 * 1024 * 1024               # 128 MiB physical
    else:
        vmem_limit = 32 * 1024 * 1024
    w_elems = dim_in * hid_p + hid_p * hid_p + hid_p * dim_out
    cost = pl.CostEstimate(
        flops=2 * n_pad * w_elems,
        transcendentals=2 * n_pad * hid_p,
        bytes_accessed=(n_pad * dim_in * x2d.dtype.itemsize
                        + w_elems * jnp.dtype(cdt).itemsize
                        + (2 * hid_p + dim_out) * 4
                        + n_pad * dim_out * jnp.dtype(out_dtype).itemsize),
    )

    def build(const_buffers, adt):
        def const(shape):
            idx = lambda i: (0,) * len(shape)
            if const_buffers is None:
                return pl.BlockSpec(shape, idx)
            # Grid-invariant blocks: one buffer suffices; double-buffering weights
            # only wastes VMEM (matters on v7x at deployment-scale hidden sizes).
            return pl.BlockSpec(shape, idx, pipeline_mode=pl.Buffered(const_buffers))

        return pl.pallas_call(
            functools.partial(mlp_kernel, act_dtype=adt, approx_recip=approx_recip),
            out_shape=jax.ShapeDtypeStruct((n_pad, dim_out), out_dtype),
            grid=(steps,),
            in_specs=[
                pl.BlockSpec((tm, dim_in), lambda i: (i, 0)),   # double-buffered x tiles
                const((dim_in, hid_p)), const((1, hid_p)),
                const((hid_p, hid_p)), const((1, hid_p)),
                const((hid_p, dim_out)), const((1, dim_out)),
            ],
            out_specs=pl.BlockSpec((tm, dim_out), lambda i: (i, 0)),
            compiler_params=pltpu.CompilerParams(
                dimension_semantics=("parallel",),              # megacore-shard token tiles
                vmem_limit_bytes=vmem_limit,
            ),
            cost_estimate=cost,
        )

    args = (x2d, prep.w1, prep.b1, prep.w2, prep.b2, prep.w3, prep.b3)
    # Preferred config first; degrade gracefully if this jax/libtpu rejects
    # Buffered(1) constant blocks or bf16 activations.
    attempts = [(1, act_dtype), (None, act_dtype)]
    if jnp.dtype(act_dtype) != jnp.dtype(jnp.float32):
        attempts.append((None, jnp.float32))
    out_p, last_err = None, None
    for bufs, adt in attempts:
        try:
            out_p = build(bufs, adt)(*args)
            break
        except Exception as e:  # deliberate graceful degradation
            last_err = e
    if out_p is None:
        raise last_err

    out = out_p if n_pad == n else out_p[:n]        # drop only the padded tail rows
    return out.reshape(*lead, dim_out)


def init_mlp_params(key, dim_in, dim_out, expansion_factor=2.0, depth=2):
    """Deterministic init matching nn.Linear shapes (weights stored as (fan_in, fan_out))."""
    hidden = int(expansion_factor * dim_out)
    ks = jax.random.split(key, 6)

    def lin_init(kw, kb, fan_in, fan_out):
        bound = 1.0 / jnp.sqrt(fan_in)
        w = jax.random.uniform(kw, (fan_in, fan_out), jnp.float32, -bound, bound)
        b = jax.random.uniform(kb, (fan_out,), jnp.float32, -bound, bound)
        return w, b

    assert depth == 2, "this script wires the default depth=2 configuration"
    w1, b1 = lin_init(ks[0], ks[1], dim_in, hidden)
    w2, b2 = lin_init(ks[2], ks[3], hidden, hidden)
    w3, b3 = lin_init(ks[4], ks[5], hidden, dim_out)
    return (w1, b1, w2, b2, w3, b3)


def mlp_reference(x, params):
    w1, b1, w2, b2, w3, b3 = params
    h = jax.nn.silu(x.astype(jnp.float32) @ w1 + b1)
    h = jax.nn.silu(h @ w2 + b2)
    return h @ w3 + b3


if __name__ == "__main__":
    key = jax.random.PRNGKey(0)
    k_x, k_p, k_x2 = jax.random.split(key, 3)

    # Shapes consistent with the torch module: MLP(16, 16) -> hidden = 2.0 * 16 = 32.
    batch, seq, dim_in, dim_out = 2, 8, 16, 16
    x = jax.random.normal(k_x, (batch, seq, dim_in), dtype=jnp.float32)
    params = init_mlp_params(k_p, dim_in, dim_out, expansion_factor=2.0, depth=2)
    ref = mlp_reference(x.reshape(-1, dim_in), params).reshape(batch, seq, dim_out)

    # 1) Default bf16-operand fast path (f32 MXU accumulation) -- prepared once.
    prep_bf16 = prepare_mlp_params(params)
    out = jax.block_until_ready(mlp_forward(x, prep_bf16))
    assert out.shape == (batch, seq, dim_out) and out.dtype == jnp.float32
    assert jnp.allclose(out, ref, atol=5e-2, rtol=5e-2), "bf16 path mismatch"

    # 2) f32-operand path (torch module's x.float() + f32 Linear semantics).
    prep_f32 = prepare_mlp_params(params, compute_dtype=jnp.float32)
    out_f32 = jax.block_until_ready(mlp_forward(x, prep_f32))
    assert jnp.allclose(out_f32, ref, atol=1e-5, rtol=1e-5), "f32 path mismatch"

    # 3) Larger token count: multi-step token grid (even step count) + tail padding.
    x_big = jax.random.normal(k_x2, (3, 700, dim_in), dtype=jnp.float32)
    ref_big = mlp_reference(x_big.reshape(-1, dim_in), params).reshape(3, 700, dim_out)
    out_big32 = jax.block_until_ready(mlp_forward(x_big, prep_f32))
    assert jnp.allclose(out_big32, ref_big, atol=1e-5, rtol=1e-5), "grid path mismatch"
    out_big16 = jax.block_until_ready(mlp_forward(x_big, prep_bf16))
    assert jnp.allclose(out_big16, ref_big, atol=5e-2, rtol=5e-2), "bf16 grid path mismatch"

    print("KERNEL_OK")
</pallas_src>

<mosaic_0001>
module attributes {stable_mosaic.version = 11 : i64} {
  func.func @mlp_kernel(%arg0: i32, %arg1: memref<16x16xf32, #tpu.memory_space<vmem>>, %arg2: memref<16x128xbf16, #tpu.memory_space<vmem>>, %arg3: memref<1x128xf32, #tpu.memory_space<vmem>>, %arg4: memref<128x128xbf16, #tpu.memory_space<vmem>>, %arg5: memref<1x128xf32, #tpu.memory_space<vmem>>, %arg6: memref<128x16xbf16, #tpu.memory_space<vmem>>, %arg7: memref<1x16xf32, #tpu.memory_space<vmem>>, %arg8: memref<16x16xf32, #tpu.memory_space<vmem>>) attributes {dimension_semantics = [#tpu.dimension_semantics<parallel>], iteration_bounds = array<i64: 1>, scalar_prefetch = 0 : i64, scratch_operands = 0 : i64, tpu.core_type = #tpu.core_type<tc>, window_params = [{transform_indices = @transform_0, window_bounds = array<i64: 16, 16>}, {pipeline_mode = #tpu.pipeline_mode<synchronous>, transform_indices = @transform_1, window_bounds = array<i64: 16, 128>}, {pipeline_mode = #tpu.pipeline_mode<synchronous>, transform_indices = @transform_2, window_bounds = array<i64: 1, 128>}, {pipeline_mode = #tpu.pipeline_mode<synchronous>, transform_indices = @transform_3, window_bounds = array<i64: 128, 128>}, {pipeline_mode = #tpu.pipeline_mode<synchronous>, transform_indices = @transform_4, window_bounds = array<i64: 1, 128>}, {pipeline_mode = #tpu.pipeline_mode<synchronous>, transform_indices = @transform_5, window_bounds = array<i64: 128, 16>}, {pipeline_mode = #tpu.pipeline_mode<synchronous>, transform_indices = @transform_6, window_bounds = array<i64: 1, 16>}, {transform_indices = @transform_7, window_bounds = array<i64: 16, 16>}]} {
    %c0 = arith.constant 0 : index
    %c0_0 = arith.constant 0 : index
    %0 = vector.load %arg1[%c0, %c0_0] : memref<16x16xf32, #tpu.memory_space<vmem>>, vector<16x16xf32>
    %1 = arith.truncf %0 : vector<16x16xf32> to vector<16x16xbf16>
    %c0_1 = arith.constant 0 : index
    %c0_2 = arith.constant 0 : index
    %2 = vector.load %arg2[%c0_1, %c0_2] : memref<16x128xbf16, #tpu.memory_space<vmem>>, vector<16x128xbf16>
    %cst = arith.constant dense<0.000000e+00> : vector<16x128xf32>
    %3 = tpu.matmul %1, %2, %cst {dimension_numbers = #tpu.dot_dimension_numbers<[1], [0], [0], [1], [0, 0, 1, 1], [], []>} : vector<16x16xbf16>, vector<16x128xbf16>, vector<16x128xf32> -> vector<16x128xf32>
    %c0_3 = arith.constant 0 : index
    %c0_4 = arith.constant 0 : index
    %4 = vector.load %arg3[%c0_3, %c0_4] : memref<1x128xf32, #tpu.memory_space<vmem>>, vector<1x128xf32>
    %5 = vector.broadcast %4 : vector<1x128xf32> to vector<16x128xf32>
    %6 = arith.addf %3, %5 : vector<16x128xf32>
    %cst_5 = arith.constant 0.000000e+00 : f32
    %7 = vector.broadcast %cst_5 : f32 to vector<16x128xf32>
    %8 = arith.subf %7, %6 : vector<16x128xf32>
    %9 = math.exp %8 : vector<16x128xf32>
    %cst_6 = arith.constant 1.000000e+00 : f32
    %10 = vector.broadcast %cst_6 : f32 to vector<16x128xf32>
    %11 = arith.addf %9, %10 : vector<16x128xf32>
    %12 = tpu.reciprocal %11 {approx = true} : vector<16x128xf32> -> vector<16x128xf32>
    %13 = arith.mulf %6, %12 : vector<16x128xf32>
    %14 = arith.truncf %13 : vector<16x128xf32> to vector<16x128xbf16>
    %c0_7 = arith.constant 0 : index
    %c0_8 = arith.constant 0 : index
    %15 = vector.load %arg4[%c0_7, %c0_8] : memref<128x128xbf16, #tpu.memory_space<vmem>>, vector<128x128xbf16>
    %cst_9 = arith.constant dense<0.000000e+00> : vector<16x128xf32>
    %16 = tpu.matmul %14, %15, %cst_9 {dimension_numbers = #tpu.dot_dimension_numbers<[1], [0], [0], [1], [0, 0, 1, 1], [], []>} : vector<16x128xbf16>, vector<128x128xbf16>, vector<16x128xf32> -> vector<16x128xf32>
    %c0_10 = arith.constant 0 : index
    %c0_11 = arith.constant 0 : index
    %17 = vector.load %arg5[%c0_10, %c0_11] : memref<1x128xf32, #tpu.memory_space<vmem>>, vector<1x128xf32>
    %18 = vector.broadcast %17 : vector<1x128xf32> to vector<16x128xf32>
    %19 = arith.addf %16, %18 : vector<16x128xf32>
    %cst_12 = arith.constant 0.000000e+00 : f32
    %20 = vector.broadcast %cst_12 : f32 to vector<16x128xf32>
    %21 = arith.subf %20, %19 : vector<16x128xf32>
    %22 = math.exp %21 : vector<16x128xf32>
    %cst_13 = arith.constant 1.000000e+00 : f32
    %23 = vector.broadcast %cst_13 : f32 to vector<16x128xf32>
    %24 = arith.addf %22, %23 : vector<16x128xf32>
    %25 = tpu.reciprocal %24 {approx = true} : vector<16x128xf32> -> vector<16x128xf32>
    %26 = arith.mulf %19, %25 : vector<16x128xf32>
    %27 = arith.truncf %26 : vector<16x128xf32> to vector<16x128xbf16>
    %c0_14 = arith.constant 0 : index
    %c0_15 = arith.constant 0 : index
    %28 = vector.load %arg6[%c0_14, %c0_15] : memref<128x16xbf16, #tpu.memory_space<vmem>>, vector<128x16xbf16>
    %cst_16 = arith.constant dense<0.000000e+00> : vector<16x16xf32>
    %29 = tpu.matmul %27, %28, %cst_16 {dimension_numbers = #tpu.dot_dimension_numbers<[1], [0], [0], [1], [0, 0, 1, 1], [], []>} : vector<16x128xbf16>, vector<128x16xbf16>, vector<16x16xf32> -> vector<16x16xf32>
    %c0_17 = arith.constant 0 : index
    %c0_18 = arith.constant 0 : index
    %30 = vector.load %arg7[%c0_17, %c0_18] : memref<1x16xf32, #tpu.memory_space<vmem>>, vector<1x16xf32>
    %31 = vector.broadcast %30 : vector<1x16xf32> to vector<16x16xf32>
    %32 = arith.addf %29, %31 : vector<16x16xf32>
    %c0_19 = arith.constant 0 : index
    %c0_20 = arith.constant 0 : index
    %33 = vector.load %arg8[%c0_19, %c0_20] : memref<16x16xf32, #tpu.memory_space<vmem>>, vector<16x16xf32>
    tpu.vector_store %arg8[%c0_19, %c0_20], %32 {strides = array<i32>} : memref<16x16xf32, #tpu.memory_space<vmem>>, vector<16x16xf32>,
    return
  }
  func.func @transform_0(%arg0: i32) -> (i32, i32) {
    %c0_i32 = arith.constant 0 : i32
    %c0_i32_0 = arith.constant 0 : i32
    return %arg0, %c0_i32 : i32, i32
  }
  func.func @transform_1(%arg0: i32) -> (i32, i32) {
    %c0_i32 = arith.constant 0 : i32
    %c0_i32_0 = arith.constant 0 : i32
    %c0_i32_1 = arith.constant 0 : i32
    return %c0_i32, %c0_i32_0 : i32, i32
  }
  func.func @transform_2(%arg0: i32) -> (i32, i32) {
    %c0_i32 = arith.constant 0 : i32
    %c0_i32_0 = arith.constant 0 : i32
    %c0_i32_1 = arith.constant 0 : i32
    return %c0_i32, %c0_i32_0 : i32, i32
  }
  func.func @transform_3(%arg0: i32) -> (i32, i32) {
    %c0_i32 = arith.constant 0 : i32
    %c0_i32_0 = arith.constant 0 : i32
    %c0_i32_1 = arith.constant 0 : i32
    return %c0_i32, %c0_i32_0 : i32, i32
  }
  func.func @transform_4(%arg0: i32) -> (i32, i32) {
    %c0_i32 = arith.constant 0 : i32
    %c0_i32_0 = arith.constant 0 : i32
    %c0_i32_1 = arith.constant 0 : i32
    return %c0_i32, %c0_i32_0 : i32, i32
  }
  func.func @transform_5(%arg0: i32) -> (i32, i32) {
    %c0_i32 = arith.constant 0 : i32
    %c0_i32_0 = arith.constant 0 : i32
    %c0_i32_1 = arith.constant 0 : i32
    return %c0_i32, %c0_i32_0 : i32, i32
  }
  func.func @transform_6(%arg0: i32) -> (i32, i32) {
    %c0_i32 = arith.constant 0 : i32
    %c0_i32_0 = arith.constant 0 : i32
    %c0_i32_1 = arith.constant 0 : i32
    return %c0_i32, %c0_i32_0 : i32, i32
  }
  func.func @transform_7(%arg0: i32) -> (i32, i32) {
    %c0_i32 = arith.constant 0 : i32
    %c0_i32_0 = arith.constant 0 : i32
    return %arg0, %c0_i32 : i32, i32
  }
}

module attributes {stable_mosaic.version = 11 : i64} {
  func.func @mlp_kernel(%arg0: i32, %arg1: memref<16x16xf32, #tpu.memory_space<vmem>>, %arg2: memref<16x128xbf16, #tpu.memory_space<vmem>>, %arg3: memref<1x128xf32, #tpu.memory_space<vmem>>, %arg4: memref<128x128xbf16, #tpu.memory_space<vmem>>, %arg5: memref<1x128xf32, #tpu.memory_space<vmem>>, %arg6: memref<128x16xbf16, #tpu.memory_space<vmem>>, %arg7: memref<1x16xf32, #tpu.memory_space<vmem>>, %arg8: memref<16x16xf32, #tpu.memory_space<vmem>>) attributes {dimension_semantics = [#tpu.dimension_semantics<parallel>], iteration_bounds = array<i64: 1>, scalar_prefetch = 0 : i64, scratch_operands = 0 : i64, tpu.core_type = #tpu.core_type<tc>, window_params = [{transform_indices = @transform_0, window_bounds = array<i64: 16, 16>}, {pipeline_mode = #tpu.pipeline_mode<synchronous>, transform_indices = @transform_1, window_bounds = array<i64: 16, 128>}, {pipeline_mode = #tpu.pipeline_mode<synchronous>, transform_indices = @transform_2, window_bounds = array<i64: 1, 128>}, {pipeline_mode = #tpu.pipeline_mode<synchronous>, transform_indices = @transform_3, window_bounds = array<i64: 128, 128>}, {pipeline_mode = #tpu.pipeline_mode<synchronous>, transform_indices = @transform_4, window_bounds = array<i64: 1, 128>}, {pipeline_mode = #tpu.pipeline_mode<synchronous>, transform_indices = @transform_5, window_bounds = array<i64: 128, 16>}, {pipeline_mode = #tpu.pipeline_mode<synchronous>, transform_indices = @transform_6, window_bounds = array<i64: 1, 16>}, {transform_indices = @transform_7, window_bounds = array<i64: 16, 16>}]} {
    %c0 = arith.constant 0 : index
    %c0_0 = arith.constant 0 : index
    %0 = vector.load %arg1[%c0, %c0_0] : memref<16x16xf32, #tpu.memory_space<vmem>>, vector<16x16xf32>
    %1 = arith.truncf %0 : vector<16x16xf32> to vector<16x16xbf16>
    %c0_1 = arith.constant 0 : index
    %c0_2 = arith.constant 0 : index
    %2 = vector.load %arg2[%c0_1, %c0_2] : memref<16x128xbf16, #tpu.memory_space<vmem>>, vector<16x128xbf16>
    %cst = arith.constant dense<0.000000e+00> : vector<16x128xf32>
    %3 = tpu.matmul %1, %2, %cst {dimension_numbers = #tpu.dot_dimension_numbers<[1], [0], [0], [1], [0, 0, 1, 1], [], []>} : vector<16x16xbf16>, vector<16x128xbf16>, vector<16x128xf32> -> vector<16x128xf32>
    %c0_3 = arith.constant 0 : index
    %c0_4 = arith.constant 0 : index
    %4 = vector.load %arg3[%c0_3, %c0_4] : memref<1x128xf32, #tpu.memory_space<vmem>>, vector<1x128xf32>
    %5 = vector.broadcast %4 : vector<1x128xf32> to vector<16x128xf32>
    %6 = arith.addf %3, %5 : vector<16x128xf32>
    %cst_5 = arith.constant 0.000000e+00 : f32
    %7 = vector.broadcast %cst_5 : f32 to vector<16x128xf32>
    %8 = arith.subf %7, %6 : vector<16x128xf32>
    %9 = math.exp %8 : vector<16x128xf32>
    %cst_6 = arith.constant 1.000000e+00 : f32
    %10 = vector.broadcast %cst_6 : f32 to vector<16x128xf32>
    %11 = arith.addf %9, %10 : vector<16x128xf32>
    %12 = tpu.reciprocal %11 {approx = true} : vector<16x128xf32> -> vector<16x128xf32>
    %13 = arith.mulf %6, %12 : vector<16x128xf32>
    %14 = arith.truncf %13 : vector<16x128xf32> to vector<16x128xbf16>
    %c0_7 = arith.constant 0 : index
    %c0_8 = arith.constant 0 : index
    %15 = vector.load %arg4[%c0_7, %c0_8] : memref<128x128xbf16, #tpu.memory_space<vmem>>, vector<128x128xbf16>
    %cst_9 = arith.constant dense<0.000000e+00> : vector<16x128xf32>
    %16 = tpu.matmul %14, %15, %cst_9 {dimension_numbers = #tpu.dot_dimension_numbers<[1], [0], [0], [1], [0, 0, 1, 1], [], []>} : vector<16x128xbf16>, vector<128x128xbf16>, vector<16x128xf32> -> vector<16x128xf32>
    %c0_10 = arith.constant 0 : index
    %c0_11 = arith.constant 0 : index
    %17 = vector.load %arg5[%c0_10, %c0_11] : memref<1x128xf32, #tpu.memory_space<vmem>>, vector<1x128xf32>
    %18 = vector.broadcast %17 : vector<1x128xf32> to vector<16x128xf32>
    %19 = arith.addf %16, %18 : vector<16x128xf32>
    %cst_12 = arith.constant 0.000000e+00 : f32
    %20 = vector.broadcast %cst_12 : f32 to vector<16x128xf32>
    %21 = arith.subf %20, %19 : vector<16x128xf32>
    %22 = math.exp %21 : vector<16x128xf32>
    %cst_13 = arith.constant 1.000000e+00 : f32
    %23 = vector.broadcast %cst_13 : f32 to vector<16x128xf32>
    %24 = arith.addf %22, %23 : vector<16x128xf32>
    %25 = tpu.reciprocal %24 {approx = true} : vector<16x128xf32> -> vector<16x128xf32>
    %26 = arith.mulf %19, %25 : vector<16x128xf32>
    %27 = arith.truncf %26 : vector<16x128xf32> to vector<16x128xbf16>
    %c0_14 = arith.constant 0 : index
    %c0_15 = arith.constant 0 : index
    %28 = vector.load %arg6[%c0_14, %c0_15] : memref<128x16xbf16, #tpu.memory_space<vmem>>, vector<128x16xbf16>
    %cst_16 = arith.constant dense<0.000000e+00> : vector<16x16xf32>
    %29 = tpu.matmul %27, %28, %cst_16 {dimension_numbers = #tpu.dot_dimension_numbers<[1], [0], [0], [1], [0, 0, 1, 1], [], []>} : vector<16x128xbf16>, vector<128x16xbf16>, vector<16x16xf32> -> vector<16x16xf32>
    %c0_17 = arith.constant 0 : index
    %c0_18 = arith.constant 0 : index
    %30 = vector.load %arg7[%c0_17, %c0_18] : memref<1x16xf32, #tpu.memory_space<vmem>>, vector<1x16xf32>
    %31 = vector.broadcast %30 : vector<1x16xf32> to vector<16x16xf32>
    %32 = arith.addf %29, %31 : vector<16x16xf32>
    %c0_19 = arith.constant 0 : index
    %c0_20 = arith.constant 0 : index
    %33 = vector.load %arg8[%c0_19, %c0_20] : memref<16x16xf32, #tpu.memory_space<vmem>>, vector<16x16xf32>
    tpu.vector_store %arg8[%c0_19, %c0_20], %32 {strides = array<i32>} : memref<16x16xf32, #tpu.memory_space<vmem>>, vector<16x16xf32>,
    return
  }
  func.func @transform_0(%arg0: i32) -> (i32, i32) {
    %c0_i32 = arith.constant 0 : i32
    %c0_i32_0 = arith.constant 0 : i32
    return %arg0, %c0_i32 : i32, i32
  }
  func.func @transform_1(%arg0: i32) -> (i32, i32) {
    %c0_i32 = arith.constant 0 : i32
    %c0_i32_0 = arith.constant 0 : i32
    %c0_i32_1 = arith.constant 0 : i32
    return %c0_i32, %c0_i32_0 : i32, i32
  }
  func.func @transform_2(%arg0: i32) -> (i32, i32) {
    %c0_i32 = arith.constant 0 : i32
    %c0_i32_0 = arith.constant 0 : i32
    %c0_i32_1 = arith.constant 0 : i32
    return %c0_i32, %c0_i32_0 : i32, i32
  }
  func.func @transform_3(%arg0: i32) -> (i32, i32) {
    %c0_i32 = arith.constant 0 : i32
    %c0_i32_0 = arith.constant 0 : i32
    %c0_i32_1 = arith.constant 0 : i32
    return %c0_i32, %c0_i32_0 : i32, i32
  }
  func.func @transform_4(%arg0: i32) -> (i32, i32) {
    %c0_i32 = arith.constant 0 : i32
    %c0_i32_0 = arith.constant 0 : i32
    %c0_i32_1 = arith.constant 0 : i32
    return %c0_i32, %c0_i32_0 : i32, i32
  }
  func.func @transform_5(%arg0: i32) -> (i32, i32) {
    %c0_i32 = arith.constant 0 : i32
    %c0_i32_0 = arith.constant 0 : i32
    %c0_i32_1 = arith.constant 0 : i32
    return %c0_i32, %c0_i32_0 : i32, i32
  }
  func.func @transform_6(%arg0: i32) -> (i32, i32) {
    %c0_i32 = arith.constant 0 : i32
    %c0_i32_0 = arith.constant 0 : i32
    %c0_i32_1 = arith.constant 0 : i32
    return %c0_i32, %c0_i32_0 : i32, i32
  }
  func.func @transform_7(%arg0: i32) -> (i32, i32) {
    %c0_i32 = arith.constant 0 : i32
    %c0_i32_0 = arith.constant 0 : i32
    return %arg0, %c0_i32 : i32, i32
  }
}

</mosaic_0001>

<bundles_post_ra>
// kernel: tpu_custom_call.1
= control target key start
LH: loop header
LB: loop body
LE: loop exit
PB: predicated region body
PF: predicated region fallthrough
CT: control target
= control target key end

     0   :  { %12 = vsyncpa [#allocation3], 0  ;;  %s722_s0 = inlined_call_operand.hbm [shape: f32[16,16], index: 0, kind: input, shape index: {}]   ;;  %s723_s1 = inlined_call_operand.vmem [shape: bf16[16,128], index: 1, kind: input, shape index: {}]   ;;  %s724_s2 = inlined_call_operand.vmem [shape: f32[1,128], index: 2, kind: input, shape index: {}]   ;;  %s725_s3 = inlined_call_operand.vmem [shape: bf16[128,128], index: 3, kind: input, shape index: {}]   ;;  %s726_s4 = inlined_call_operand.hbm [shape: f32[1,128], index: 4, kind: input, shape index: {}]   ;;  %s727_s5 = inlined_call_operand.vmem [shape: bf16[128,16], index: 5, kind: input, shape index: {}]   ;;  %s728_s6 = inlined_call_operand.vmem [shape: f32[1,16], index: 6, kind: input, shape index: {}]   ;;  %s729_s7 = inlined_call_operand.hbm [shape: f32[16,16], index: 7, kind: output, shape index: {}]  }
   0x1   :  { %13 = vsyncpa [#allocation6], 0 }
   0x2   :  { %14 = vsyncpa [#allocation4], 0  ;;  %s580_s24 = smov [#allocation2]  }
   0x3   :  { %s20_s25 = sshll.u32 %s580_s24, 4  ;;  %s21_s25 = int_to_ptr.vmem [resolvable:$true] %s20_s25 }
   0x4   :  { %s522_s26 = scalar_lea.vmem %s21_s25, 256  ;;  %p527_p1 = scmp.lt.s32.totalorder %s21_s25, %s21_s25 }
   0x5   :  { %p523_p0 = scmp.ne.s32.totalorder %s21_s25, %s522_s26  ;;  %p528_p2 = scmp.lt.s32.totalorder %s522_s26, %s522_s26 }
   0x7   :  { %p529_p3 = por %p528_p2, %p527_p1 }
   0x9   :  { %p530_p4 = pnand %p529_p3, %p523_p0 }
   0xb   :  { %533 = shalt.err (!%p530_p4)
}
   0xc   :  { %s581_s27 = smov 128   ;;  %s582_s28 = smov 8  }
   0xd   :  { %26 = dma.hbm_to_vmem [thread:$0]  %s722_s0, 256, %s21_s25, [#allocation3], %s581_s27, %s581_s27, %s582_s28  }
   0xe   :  { %s583_s8 = smov [#allocation5]  }
   0xf   :  { %s39_s9 = sshll.u32 %s583_s8, 4  ;;  %s40_s9 = int_to_ptr.vmem [resolvable:$true] %s39_s9 }
  0x10   :  { %s542_s10 = scalar_lea.vmem %s40_s9, 16  ;;  %s546_s11 = scalar_lea.vmem %s40_s9, 32 }
  0x11   :  { %p543_p5 = scmp.ne.s32.totalorder %s40_s9, %s542_s10  ;;  %p547_p6 = scmp.lt.s32.totalorder %s40_s9, %s40_s9 }
  0x12   :  { %p548_p7 = scmp.lt.s32.totalorder %s546_s11, %s542_s10 }
  0x14   :  { %p549_p8 = por %p548_p7, %p547_p6 }
  0x16   :  { %p550_p9 = pnand %p549_p8, %p543_p5 }
  0x18   :  { %553 = shalt.err (!%p550_p9)
}
  0x19   :  { %42 = dma.hbm_to_vmem [thread:$0]  %s726_s4, 16, %s40_s9, [#allocation6]  }
  0x1a   :  { %574 = dma.done.wait [#allocation3], 256  }
  0x1b   :  { %575 = vsyncadd [#allocation3], 4294967040 }
  0x1c   :  { %576 = dma.done.wait [#allocation6], 16  }
  0x1d   :  { %577 = vsyncadd [#allocation6], 4294967280  ;;  %v584_v0 = vmov 0.0   ;;  %vm585_vm0 = vmmov 0   ;;  %v481_v1 = vld [vmem:[%s723_s1] sm:$0xff]   ;;  %v55_v3 = vld [vmem:[#allocation2 + $0x8] sm:$0xff] }
  0x1e   :  { %428 = vmatprep.subr.bf16.mxu0 %v584_v0  ;;  %430 = vmatprep.mubr.msk.bf16.mxu0 %vm585_vm0, %v584_v0  ;;  %v54_v2 = vld [vmem:[#allocation2] sm:$0xff]  ;;  %vm72_vm1 = vcmask 130048   ;;  %v482_v5 = vld [vmem:[%s725_s3 + $0x38] sm:$0xff]   ;;  %v483_v6 = vld [vmem:[%s725_s3 + $0x30] sm:$0xff]   ;;  %s586_s22 = smov [#allocation7]  }
  0x1f   :  { %434 = vmatprep.subr.bf16.mxu1 %v584_v0  ;;  %450 = vmatprep.mubr.msk.bf16.mxu1 %vm585_vm0, %v584_v0  ;;  %v56_v4 = vpack.c.bf16 %v55_v3, %v54_v2  ;;  %v484_v7 = vld [vmem:[%s725_s3 + $0x28] sm:$0xff]   ;;  %v485_v8 = vld [vmem:[%s725_s3 + $0x20] sm:$0xff]   ;;  %v486_v9 = vld [vmem:[%s725_s3 + $0x18] sm:$0xff]   ;;  %s374_s23 = sshll.u32 %s586_s22, 4  ;;  %s375_s23 = int_to_ptr.vmem [resolvable:$true] %s374_s23 }
  0x20   :  { %429 = vmatpush3.bf16.msra.mxu0 %v481_v1  ;;  %435 = vmatpush3.bf16.msra.mxu1 %v482_v5  ;;  %v487_v10 = vld [vmem:[%s725_s3 + $0x10] sm:$0xff]   ;;  %v488_v11 = vld [vmem:[%s725_s3 + $0x8] sm:$0xff]   ;;  %v489_v12 = vld [vmem:[%s725_s3] sm:$0xff]   ;;  %s554_s24 = scalar_lea.vmem %s375_s23, 256  ;;  %p559_p11 = scmp.lt.s32.totalorder %s375_s23, %s375_s23 }
  0x21   :  { %454 = vmatprep.subr.bf16.mxu0 %v584_v0  ;;  %436 = vmatprep.subr.bf16.mxu1 %v584_v0  ;;  %v387_v13 = vld [vmem:[%s724_s2] ss:$0 sm:$0xff]  ;;  %v490_v33 = vld [vmem:[%s727_s5 + $0x38] sm:$0xff]   ;;  %v491_v34 = vld [vmem:[%s727_s5 + $0x30] sm:$0xff]   ;;  %p555_p10 = scmp.ne.s32.totalorder %s375_s23, %s554_s24  ;;  %p560_p12 = scmp.lt.s32.totalorder %s554_s24, %s554_s24 }
  0x22   :  { %v492_v35 = vld [vmem:[%s727_s5 + $0x28] sm:$0xff]   ;;  %v493_v36 = vld [vmem:[%s727_s5 + $0x20] sm:$0xff]   ;;  %v494_v37 = vld [vmem:[%s727_s5 + $0x18] sm:$0xff]  }
  0x23   :  { %431 = vmatmul.mubr.msk.bf16.vlgmr.msra.gmra.mxu0 %vm72_vm1, %v56_v4  ;;  %v495_v38 = vld [vmem:[%s727_s5 + $0x10] sm:$0xff]   ;;  %v496_v39 = vld [vmem:[%s727_s5 + $0x8] sm:$0xff]   ;;  %v497_v40 = vld [vmem:[%s727_s5] sm:$0xff]   ;;  %p561_p13 = por %p560_p12, %p559_p11 }
  0x24   :  { %470 = vmatprep.mubr.msk.bf16.mxu0 %vm585_vm0, %v584_v0  ;;  %437 = vmatpush3.bf16.msra.mxu1 %v483_v6  ;;  %v390_v41 = vld [vmem:[#allocation5] ss:$0 sm:$0xff]  ;;  %v399_v61 = vld [vmem:[%s728_s6] ss:$0 sm:$0xff] }
  0x25   :  { %438 = vmatprep.subr.bf16.mxu1 %v584_v0  ;;  %455 = vmatpush3.bf16.msra.mxu0 %v490_v33  ;;  %p562_p0 = pnand %p561_p13, %p555_p10 }
  0x26   :  { %456 = vmatprep.subr.bf16.mxu0 %v584_v0 }
  0x28   :  { %439 = vmatpush3.bf16.msra.mxu1 %v484_v7 }
  0x29   :  { %440 = vmatprep.subr.bf16.mxu1 %v584_v0  ;;  %457 = vmatpush3.bf16.msra.mxu0 %v491_v34 }
  0x2a   :  { %458 = vmatprep.subr.bf16.mxu0 %v584_v0 }
  0x2c   :  { %441 = vmatpush3.bf16.msra.mxu1 %v485_v8 }
  0x2d   :  { %442 = vmatprep.subr.bf16.mxu1 %v584_v0  ;;  %459 = vmatpush3.bf16.msra.mxu0 %v492_v35 }
  0x2e   :  { %460 = vmatprep.subr.bf16.mxu0 %v584_v0 }
  0x30   :  { %443 = vmatpush3.bf16.msra.mxu1 %v486_v9 }
  0x31   :  { %444 = vmatprep.subr.bf16.mxu1 %v584_v0  ;;  %461 = vmatpush3.bf16.msra.mxu0 %v493_v36 }
  0x32   :  { %462 = vmatprep.subr.bf16.mxu0 %v584_v0 }
  0x34   :  { %445 = vmatpush3.bf16.msra.mxu1 %v487_v10 }
  0x35   :  { %446 = vmatprep.subr.bf16.mxu1 %v584_v0  ;;  %463 = vmatpush3.bf16.msra.mxu0 %v494_v37 }
  0x36   :  { %464 = vmatprep.subr.bf16.mxu0 %v584_v0 }
  0x38   :  { %447 = vmatpush3.bf16.msra.mxu1 %v488_v11 }
  0x39   :  { %448 = vmatprep.subr.bf16.mxu1 %v584_v0  ;;  %465 = vmatpush3.bf16.msra.mxu0 %v495_v38 }
  0x3a   :  { %466 = vmatprep.subr.bf16.mxu0 %v584_v0 }
  0x3c   :  { %449 = vmatpush3.bf16.msra.mxu1 %v489_v12 }
  0x3d   :  { %467 = vmatpush3.bf16.msra.mxu0 %v496_v39 }
  0x3e   :  { %468 = vmatprep.subr.bf16.mxu0 %v584_v0 }
  0x41   :  { %469 = vmatpush3.bf16.msra.mxu0 %v497_v40 }
  0xe3   :  { %v110_v14 = vpop.f32.mrf.mxu0 }
  0xe4   :  { %v111_v15 = vadd.f32 %v387_v13, %v110_v14 }
  0xe5   :  { %v432_v16 = vpop.f32.mrf.mxu0 }
  0xe6   :  { %v117_v17 = vsub.f32 0.0, %v111_v15 }
  0xe7   :  { %v113_v18 = vpop.f32.mrf.mxu0 }
  0xe8   :  { %v119_v19 = vmul.f32 1.442695, %v117_v17  ;;  %v114_v20 = vadd.f32 %v387_v13, %v113_v18 }
  0xe9   :  { %v433_v21 = vpop.f32.mrf.mxu0 }
  0xea   :  { %498 = vpow2.f32 %v119_v19  ;;  %v118_v22 = vsub.f32 0.0, %v114_v20 }
  0xec   :  { %v121_v23 = vmul.f32 1.442695, %v118_v22 }
  0xee   :  { %500 = vpow2.f32 %v121_v23 }
  0xf7   :  { %v499_v24 = vpop.eup %498 }
  0xf8   :  { %v123_v25 = vadd.f32 1.0, %v499_v24 }
  0xfa   :  { %502 = vrcp.f32 %v123_v25 }
  0xfb   :  { %v501_v26 = vpop.eup %500 }
  0xfc   :  { %v124_v27 = vadd.f32 1.0, %v501_v26 }
  0xfe   :  { %504 = vrcp.f32 %v124_v27 }
 0x107   :  { %v503_v28 = vpop.eup %502 }
 0x108   :  { %v127_v30 = vmul.f32 %v503_v28, %v111_v15 }
 0x10b   :  { %v505_v29 = vpop.eup %504 }
 0x10c   :  { %v128_v31 = vmul.f32 %v505_v29, %v114_v20 }
 0x10e   :  { %v129_v32 = vpack.c.bf16 %v128_v31, %v127_v30 }
 0x110   :  { %451 = vmatmul.mubr.bf16.vlgmr.msra.gmra.mxu1 %v129_v32 }
 0x1d0   :  { %v235_v42 = vpop.f32.mrf.mxu1 }
 0x1d1   :  { %v236_v43 = vadd.f32 %v390_v41, %v235_v42 }
 0x1d2   :  { %v452_v44 = vpop.f32.mrf.mxu1 }
 0x1d3   :  { %v242_v45 = vsub.f32 0.0, %v236_v43 }
 0x1d4   :  { %v238_v46 = vpop.f32.mrf.mxu1 }
 0x1d5   :  { %v244_v47 = vmul.f32 1.442695, %v242_v45  ;;  %v239_v48 = vadd.f32 %v390_v41, %v238_v46 }
 0x1d6   :  { %v453_v49 = vpop.f32.mrf.mxu1 }
 0x1d7   :  { %506 = vpow2.f32 %v244_v47  ;;  %v243_v50 = vsub.f32 0.0, %v239_v48 }
 0x1d9   :  { %v246_v51 = vmul.f32 1.442695, %v243_v50 }
 0x1db   :  { %508 = vpow2.f32 %v246_v51 }
 0x1e4   :  { %v507_v52 = vpop.eup %506 }
 0x1e5   :  { %v248_v53 = vadd.f32 1.0, %v507_v52 }
 0x1e7   :  { %510 = vrcp.f32 %v248_v53 }
 0x1e8   :  { %v509_v54 = vpop.eup %508 }
 0x1e9   :  { %v249_v55 = vadd.f32 1.0, %v509_v54 }
 0x1eb   :  { %512 = vrcp.f32 %v249_v55 }
 0x1f4   :  { %v511_v56 = vpop.eup %510 }
 0x1f5   :  { %v252_v58 = vmul.f32 %v511_v56, %v236_v43 }
 0x1f8   :  { %v513_v57 = vpop.eup %512 }
 0x1f9   :  { %v253_v59 = vmul.f32 %v513_v57, %v239_v48 }
 0x1fb   :  { %v254_v60 = vpack.c.bf16 %v253_v59, %v252_v58 }
 0x1fd   :  { %471 = vmatmul.mubr.bf16.vlgmr.msra.gmra.mxu0 %v254_v60 }
 0x2bd   :  { %v360_v62 = vpop.f32.mrf.mxu0 }
 0x2be   :  { %v361_v63 = vadd.f32 %v399_v61, %v360_v62 }
 0x2bf   :  { %v472_v0 = vpop.f32.mrf.mxu0 }
 0x2c0   :  { %367 = vst.msk [vmem:[#allocation7] sm:$0xff] %vm72_vm1, %v361_v63 }
 0x2c1   :  { %v363_v1 = vpop.f32.mrf.mxu0 }
 0x2c2   :  { %v364_v2 = vadd.f32 %v399_v61, %v363_v1 }
 0x2c3   :  { %v473_v3 = vpop.f32.mrf.mxu0 }
 0x2c4   :  { %368 = vst.msk [vmem:[#allocation7 + $0x8] sm:$0xff] %vm72_vm1, %v364_v2 }
 0x2c5   :  { %565 = shalt.err (!%p562_p0)
}
 0x2c6   :  { %380 = dma.vmem_to_hbm [thread:$0]  %s375_s23, 256, %s729_s7, [#allocation4], %s581_s27, %s581_s27, %s582_s28  }
 0x2c7   :  { %578 = dma.done.wait [#allocation4], 256  }
 0x2c8   :  { %579 = vsyncadd [#allocation4], 4294967040 }
 0x2c9   :  { %384 = vsyncpa [#allocation3], 1 }
 0x2ca   :  { %385 = vsyncpa [#allocation6], 1 }
 0x2cb   :  { %386 = vsyncpa [#allocation4], 1 }

// kernel: tpu_custom_call.1
= control target key start
LH: loop header
LB: loop body
LE: loop exit
PB: predicated region body
PF: predicated region fallthrough
CT: control target
= control target key end

     0   :  { %12 = vsyncpa [#allocation3], 0  ;;  %s722_s0 = inlined_call_operand.hbm [shape: f32[16,16], index: 0, kind: input, shape index: {}]   ;;  %s723_s1 = inlined_call_operand.vmem [shape: bf16[16,128], index: 1, kind: input, shape index: {}]   ;;  %s724_s2 = inlined_call_operand.vmem [shape: f32[1,128], index: 2, kind: input, shape index: {}]   ;;  %s725_s3 = inlined_call_operand.vmem [shape: bf16[128,128], index: 3, kind: input, shape index: {}]   ;;  %s726_s4 = inlined_call_operand.hbm [shape: f32[1,128], index: 4, kind: input, shape index: {}]   ;;  %s727_s5 = inlined_call_operand.vmem [shape: bf16[128,16], index: 5, kind: input, shape index: {}]   ;;  %s728_s6 = inlined_call_operand.vmem [shape: f32[1,16], index: 6, kind: input, shape index: {}]   ;;  %s729_s7 = inlined_call_operand.hbm [shape: f32[16,16], index: 7, kind: output, shape index: {}]  }
   0x1   :  { %13 = vsyncpa [#allocation6], 0 }
   0x2   :  { %14 = vsyncpa [#allocation4], 0  ;;  %s580_s24 = smov [#allocation2]  }
   0x3   :  { %s20_s25 = sshll.u32 %s580_s24, 4  ;;  %s21_s25 = int_to_ptr.vmem [resolvable:$true] %s20_s25 }
   0x4   :  { %s522_s26 = scalar_lea.vmem %s21_s25, 256  ;;  %p527_p1 = scmp.lt.s32.totalorder %s21_s25, %s21_s25 }
   0x5   :  { %p523_p0 = scmp.ne.s32.totalorder %s21_s25, %s522_s26  ;;  %p528_p2 = scmp.lt.s32.totalorder %s522_s26, %s522_s26 }
   0x7   :  { %p529_p3 = por %p528_p2, %p527_p1 }
   0x9   :  { %p530_p4 = pnand %p529_p3, %p523_p0 }
   0xb   :  { %533 = shalt.err (!%p530_p4)
}
   0xc   :  { %s581_s27 = smov 128   ;;  %s582_s28 = smov 8  }
   0xd   :  { %26 = dma.hbm_to_vmem [thread:$0]  %s722_s0, 256, %s21_s25, [#allocation3], %s581_s27, %s581_s27, %s582_s28  }
   0xe   :  { %s583_s8 = smov [#allocation5]  }
   0xf   :  { %s39_s9 = sshll.u32 %s583_s8, 4  ;;  %s40_s9 = int_to_ptr.vmem [resolvable:$true] %s39_s9 }
  0x10   :  { %s542_s10 = scalar_lea.vmem %s40_s9, 16  ;;  %s546_s11 = scalar_lea.vmem %s40_s9, 32 }
  0x11   :  { %p543_p5 = scmp.ne.s32.totalorder %s40_s9, %s542_s10  ;;  %p547_p6 = scmp.lt.s32.totalorder %s40_s9, %s40_s9 }
  0x12   :  { %p548_p7 = scmp.lt.s32.totalorder %s546_s11, %s542_s10 }
  0x14   :  { %p549_p8 = por %p548_p7, %p547_p6 }
  0x16   :  { %p550_p9 = pnand %p549_p8, %p543_p5 }
  0x18   :  { %553 = shalt.err (!%p550_p9)
}
  0x19   :  { %42 = dma.hbm_to_vmem [thread:$0]  %s726_s4, 16, %s40_s9, [#allocation6]  }
  0x1a   :  { %574 = dma.done.wait [#allocation3], 256  }
  0x1b   :  { %575 = vsyncadd [#allocation3], 4294967040 }
  0x1c   :  { %576 = dma.done.wait [#allocation6], 16  }
  0x1d   :  { %577 = vsyncadd [#allocation6], 4294967280  ;;  %v584_v0 = vmov 0.0   ;;  %vm585_vm0 = vmmov 0   ;;  %v481_v1 = vld [vmem:[%s723_s1] sm:$0xff]   ;;  %v55_v3 = vld [vmem:[#allocation2 + $0x8] sm:$0xff] }
  0x1e   :  { %428 = vmatprep.subr.bf16.mxu0 %v584_v0  ;;  %430 = vmatprep.mubr.msk.bf16.mxu0 %vm585_vm0, %v584_v0  ;;  %v54_v2 = vld [vmem:[#allocation2] sm:$0xff]  ;;  %vm72_vm1 = vcmask 130048   ;;  %v482_v5 = vld [vmem:[%s725_s3 + $0x38] sm:$0xff]   ;;  %v483_v6 = vld [vmem:[%s725_s3 + $0x30] sm:$0xff]   ;;  %s586_s22 = smov [#allocation7]  }
  0x1f   :  { %434 = vmatprep.subr.bf16.mxu1 %v584_v0  ;;  %450 = vmatprep.mubr.msk.bf16.mxu1 %vm585_vm0, %v584_v0  ;;  %v56_v4 = vpack.c.bf16 %v55_v3, %v54_v2  ;;  %v484_v7 = vld [vmem:[%s725_s3 + $0x28] sm:$0xff]   ;;  %v485_v8 = vld [vmem:[%s725_s3 + $0x20] sm:$0xff]   ;;  %v486_v9 = vld [vmem:[%s725_s3 + $0x18] sm:$0xff]   ;;  %s374_s23 = sshll.u32 %s586_s22, 4  ;;  %s375_s23 = int_to_ptr.vmem [resolvable:$true] %s374_s23 }
  0x20   :  { %429 = vmatpush3.bf16.msra.mxu0 %v481_v1  ;;  %435 = vmatpush3.bf16.msra.mxu1 %v482_v5  ;;  %v487_v10 = vld [vmem:[%s725_s3 + $0x10] sm:$0xff]   ;;  %v488_v11 = vld [vmem:[%s725_s3 + $0x8] sm:$0xff]   ;;  %v489_v12 = vld [vmem:[%s725_s3] sm:$0xff]   ;;  %s554_s24 = scalar_lea.vmem %s375_s23, 256  ;;  %p559_p11 = scmp.lt.s32.totalorder %s375_s23, %s375_s23 }
  0x21   :  { %454 = vmatprep.subr.bf16.mxu0 %v584_v0  ;;  %436 = vmatprep.subr.bf16.mxu1 %v584_v0  ;;  %v387_v13 = vld [vmem:[%s724_s2] ss:$0 sm:$0xff]  ;;  %v490_v33 = vld [vmem:[%s727_s5 + $0x38] sm:$0xff]   ;;  %v491_v34 = vld [vmem:[%s727_s5 + $0x30] sm:$0xff]   ;;  %p555_p10 = scmp.ne.s32.totalorder %s375_s23, %s554_s24  ;;  %p560_p12 = scmp.lt.s32.totalorder %s554_s24, %s554_s24 }
  0x22   :  { %v492_v35 = vld [vmem:[%s727_s5 + $0x28] sm:$0xff]   ;;  %v493_v36 = vld [vmem:[%s727_s5 + $0x20] sm:$0xff]   ;;  %v494_v37 = vld [vmem:[%s727_s5 + $0x18] sm:$0xff]  }
  0x23   :  { %431 = vmatmul.mubr.msk.bf16.vlgmr.msra.gmra.mxu0 %vm72_vm1, %v56_v4  ;;  %v495_v38 = vld [vmem:[%s727_s5 + $0x10] sm:$0xff]   ;;  %v496_v39 = vld [vmem:[%s727_s5 + $0x8] sm:$0xff]   ;;  %v497_v40 = vld [vmem:[%s727_s5] sm:$0xff]   ;;  %p561_p13 = por %p560_p12, %p559_p11 }
  0x24   :  { %470 = vmatprep.mubr.msk.bf16.mxu0 %vm585_vm0, %v584_v0  ;;  %437 = vmatpush3.bf16.msra.mxu1 %v483_v6  ;;  %v390_v41 = vld [vmem:[#allocation5] ss:$0 sm:$0xff]  ;;  %v399_v61 = vld [vmem:[%s728_s6] ss:$0 sm:$0xff] }
  0x25   :  { %438 = vmatprep.subr.bf16.mxu1 %v584_v0  ;;  %455 = vmatpush3.bf16.msra.mxu0 %v490_v33  ;;  %p562_p0 = pnand %p561_p13, %p555_p10 }
  0x26   :  { %456 = vmatprep.subr.bf16.mxu0 %v584_v0 }
  0x28   :  { %439 = vmatpush3.bf16.msra.mxu1 %v484_v7 }
  0x29   :  { %440 = vmatprep.subr.bf16.mxu1 %v584_v0  ;;  %457 = vmatpush3.bf16.msra.mxu0 %v491_v34 }
  0x2a   :  { %458 = vmatprep.subr.bf16.mxu0 %v584_v0 }
  0x2c   :  { %441 = vmatpush3.bf16.msra.mxu1 %v485_v8 }
  0x2d   :  { %442 = vmatprep.subr.bf16.mxu1 %v584_v0  ;;  %459 = vmatpush3.bf16.msra.mxu0 %v492_v35 }
  0x2e   :  { %460 = vmatprep.subr.bf16.mxu0 %v584_v0 }
  0x30   :  { %443 = vmatpush3.bf16.msra.mxu1 %v486_v9 }
  0x31   :  { %444 = vmatprep.subr.bf16.mxu1 %v584_v0  ;;  %461 = vmatpush3.bf16.msra.mxu0 %v493_v36 }
  0x32   :  { %462 = vmatprep.subr.bf16.mxu0 %v584_v0 }
  0x34   :  { %445 = vmatpush3.bf16.msra.mxu1 %v487_v10 }
  0x35   :  { %446 = vmatprep.subr.bf16.mxu1 %v584_v0  ;;  %463 = vmatpush3.bf16.msra.mxu0 %v494_v37 }
  0x36   :  { %464 = vmatprep.subr.bf16.mxu0 %v584_v0 }
  0x38   :  { %447 = vmatpush3.bf16.msra.mxu1 %v488_v11 }
  0x39   :  { %448 = vmatprep.subr.bf16.mxu1 %v584_v0  ;;  %465 = vmatpush3.bf16.msra.mxu0 %v495_v38 }
  0x3a   :  { %466 = vmatprep.subr.bf16.mxu0 %v584_v0 }
  0x3c   :  { %449 = vmatpush3.bf16.msra.mxu1 %v489_v12 }
  0x3d   :  { %467 = vmatpush3.bf16.msra.mxu0 %v496_v39 }
  0x3e   :  { %468 = vmatprep.subr.bf16.mxu0 %v584_v0 }
  0x41   :  { %469 = vmatpush3.bf16.msra.mxu0 %v497_v40 }
  0xe3   :  { %v110_v14 = vpop.f32.mrf.mxu0 }
  0xe4   :  { %v111_v15 = vadd.f32 %v387_v13, %v110_v14 }
  0xe5   :  { %v432_v16 = vpop.f32.mrf.mxu0 }
  0xe6   :  { %v117_v17 = vsub.f32 0.0, %v111_v15 }
  0xe7   :  { %v113_v18 = vpop.f32.mrf.mxu0 }
  0xe8   :  { %v119_v19 = vmul.f32 1.442695, %v117_v17  ;;  %v114_v20 = vadd.f32 %v387_v13, %v113_v18 }
  0xe9   :  { %v433_v21 = vpop.f32.mrf.mxu0 }
  0xea   :  { %498 = vpow2.f32 %v119_v19  ;;  %v118_v22 = vsub.f32 0.0, %v114_v20 }
  0xec   :  { %v121_v23 = vmul.f32 1.442695, %v118_v22 }
  0xee   :  { %500 = vpow2.f32 %v121_v23 }
  0xf7   :  { %v499_v24 = vpop.eup %498 }
  0xf8   :  { %v123_v25 = vadd.f32 1.0, %v499_v24 }
  0xfa   :  { %502 = vrcp.f32 %v123_v25 }
  0xfb   :  { %v501_v26 = vpop.eup %500 }
  0xfc   :  { %v124_v27 = vadd.f32 1.0, %v501_v26 }
  0xfe   :  { %504 = vrcp.f32 %v124_v27 }
 0x107   :  { %v503_v28 = vpop.eup %502 }
 0x108   :  { %v127_v30 = vmul.f32 %v503_v28, %v111_v15 }
 0x10b   :  { %v505_v29 = vpop.eup %504 }
 0x10c   :  { %v128_v31 = vmul.f32 %v505_v29, %v114_v20 }
 0x10e   :  { %v129_v32 = vpack.c.bf16 %v128_v31, %v127_v30 }
 0x110   :  { %451 = vmatmul.mubr.bf16.vlgmr.msra.gmra.mxu1 %v129_v32 }
 0x1d0   :  { %v235_v42 = vpop.f32.mrf.mxu1 }
 0x1d1   :  { %v236_v43 = vadd.f32 %v390_v41, %v235_v42 }
 0x1d2   :  { %v452_v44 = vpop.f32.mrf.mxu1 }
 0x1d3   :  { %v242_v45 = vsub.f32 0.0, %v236_v43 }
 0x1d4   :  { %v238_v46 = vpop.f32.mrf.mxu1 }
 0x1d5   :  { %v244_v47 = vmul.f32 1.442695, %v242_v45  ;;  %v239_v48 = vadd.f32 %v390_v41, %v238_v46 }
 0x1d6   :  { %v453_v49 = vpop.f32.mrf.mxu1 }
 0x1d7   :  { %506 = vpow2.f32 %v244_v47  ;;  %v243_v50 = vsub.f32 0.0, %v239_v48 }
 0x1d9   :  { %v246_v51 = vmul.f32 1.442695, %v243_v50 }
 0x1db   :  { %508 = vpow2.f32 %v246_v51 }
 0x1e4   :  { %v507_v52 = vpop.eup %506 }
 0x1e5   :  { %v248_v53 = vadd.f32 1.0, %v507_v52 }
 0x1e7   :  { %510 = vrcp.f32 %v248_v53 }
 0x1e8   :  { %v509_v54 = vpop.eup %508 }
 0x1e9   :  { %v249_v55 = vadd.f32 1.0, %v509_v54 }
 0x1eb   :  { %512 = vrcp.f32 %v249_v55 }
 0x1f4   :  { %v511_v56 = vpop.eup %510 }
 0x1f5   :  { %v252_v58 = vmul.f32 %v511_v56, %v236_v43 }
 0x1f8   :  { %v513_v57 = vpop.eup %512 }
 0x1f9   :  { %v253_v59 = vmul.f32 %v513_v57, %v239_v48 }
 0x1fb   :  { %v254_v60 = vpack.c.bf16 %v253_v59, %v252_v58 }
 0x1fd   :  { %471 = vmatmul.mubr.bf16.vlgmr.msra.gmra.mxu0 %v254_v60 }
 0x2bd   :  { %v360_v62 = vpop.f32.mrf.mxu0 }
 0x2be   :  { %v361_v63 = vadd.f32 %v399_v61, %v360_v62 }
 0x2bf   :  { %v472_v0 = vpop.f32.mrf.mxu0 }
 0x2c0   :  { %367 = vst.msk [vmem:[#allocation7] sm:$0xff] %vm72_vm1, %v361_v63 }
 0x2c1   :  { %v363_v1 = vpop.f32.mrf.mxu0 }
 0x2c2   :  { %v364_v2 = vadd.f32 %v399_v61, %v363_v1 }
 0x2c3   :  { %v473_v3 = vpop.f32.mrf.mxu0 }
 0x2c4   :  { %368 = vst.msk [vmem:[#allocation7 + $0x8] sm:$0xff] %vm72_vm1, %v364_v2 }
 0x2c5   :  { %565 = shalt.err (!%p562_p0)
}
 0x2c6   :  { %380 = dma.vmem_to_hbm [thread:$0]  %s375_s23, 256, %s729_s7, [#allocation4], %s581_s27, %s581_s27, %s582_s28  }
 0x2c7   :  { %578 = dma.done.wait [#allocation4], 256  }
 0x2c8   :  { %579 = vsyncadd [#allocation4], 4294967040 }
 0x2c9   :  { %384 = vsyncpa [#allocation3], 1 }
 0x2ca   :  { %385 = vsyncpa [#allocation6], 1 }
 0x2cb   :  { %386 = vsyncpa [#allocation4], 1 }

</bundles_post_ra>
